<compile_context>
chip_gen: v5e
topology: v5e:2x2
jax: 0.10.0
libtpu: 0.0.40
codegen_flags: <defaults>
</compile_context>

<pallas_src>
import functools

import jax
import jax.numpy as jnp
from jax.experimental import pallas as pl
from jax.experimental.pallas import tpu as pltpu


def msa_kernel(x_ref, wqkv_ref, bqkv_ref, wo_ref, bo_ref, o_ref, *, n_heads):
    B, N, D = x_ref.shape
    H = n_heads
    dh = D // H
    M = B * N

    # Flatten (B, N) -> M for the projection matmuls (leading-dim reshape only).
    x = x_ref[...].reshape(M, D).astype(jnp.bfloat16)

    # Single fused qkv projection: (M, D) @ (D, 3D) -> (M, 3D), f32 accumulate.
    # The 1/sqrt(d_head) score scale is pre-folded into the q columns of
    # wqkv/bqkv by prepare_msa_params.
    qkv = jnp.dot(x, wqkv_ref[...],
                  preferred_element_type=jnp.float32) + bqkv_ref[...]

    # Per-head attention.  H is tiny and static, so this is a trace-time loop;
    # the MXU push count is the same as a head-batched einsum, but the lane
    # slices at dh-multiples avoid any sublane<->leading-dim relayout.
    head_outs = []
    for h in range(H):
        qh = qkv[:, 0 * D + h * dh: 0 * D + (h + 1) * dh]
        kh = qkv[:, 1 * D + h * dh: 1 * D + (h + 1) * dh]
        vh = qkv[:, 2 * D + h * dh: 2 * D + (h + 1) * dh]
        qh = qh.reshape(B, N, dh).astype(jnp.bfloat16)
        kh = kh.reshape(B, N, dh).astype(jnp.bfloat16)
        vh = vh.reshape(B, N, dh).astype(jnp.bfloat16)

        # Scaled dot-product attention (scale already folded into q).
        s = jnp.einsum('bnd,bmd->bnm', qh, kh,
                       preferred_element_type=jnp.float32)        # (B, N, N)
        s = s - jnp.max(s, axis=-1, keepdims=True)
        e = jnp.exp(s)
        p = e * pl.reciprocal(jnp.sum(e, axis=-1, keepdims=True), approx=True)

        oh = jnp.einsum('bnm,bmd->bnd', p.astype(jnp.bfloat16), vh,
                        preferred_element_type=jnp.float32)       # (B, N, dh)
        head_outs.append(oh.reshape(M, dh))

    # Lane-concat of the head outputs == torch's transpose+view head concat,
    # then a single output projection matmul (M, D) @ (D, D).
    o = jnp.concatenate(head_outs, axis=-1).astype(jnp.bfloat16)  # (M, D)
    y = jnp.dot(o, wo_ref[...],
                preferred_element_type=jnp.float32) + bo_ref[...]  # (M, D)
    o_ref[...] = y.reshape(B, N, D)


def prepare_msa_params(params, n_heads):
    """One-time weight preparation (NOT in the per-call path).

    Folds 1/sqrt(d_head) into the q columns, casts matmul operands to bf16,
    reshapes biases to 2-D rows.
    """
    D = params["w_o"].shape[0]
    dh = D // n_heads
    scale = 1.0 / (dh ** 0.5)

    col_scale = jnp.concatenate(
        [jnp.full((D,), scale, jnp.float32), jnp.ones((2 * D,), jnp.float32)])
    w_qkv = (params["w_qkv"] * col_scale[None, :]).astype(jnp.bfloat16)  # (D,3D)
    b_qkv = (params["b_qkv"] * col_scale).reshape(1, 3 * D).astype(jnp.float32)
    w_o = params["w_o"].astype(jnp.bfloat16)                            # (D, D)
    b_o = params["b_o"].reshape(1, D).astype(jnp.float32)
    return {"w_qkv": w_qkv, "b_qkv": b_qkv, "w_o": w_o, "b_o": b_o}


@functools.partial(jax.jit, static_argnums=2)
def msa_forward(x, prepared, n_heads):
    B, N, D = x.shape
    vmem = lambda: pl.BlockSpec(memory_space=pltpu.MemorySpace.VMEM)
    return pl.pallas_call(
        functools.partial(msa_kernel, n_heads=n_heads),
        out_shape=jax.ShapeDtypeStruct((B, N, D), jnp.float32),
        in_specs=[vmem() for _ in range(5)],
        out_specs=vmem(),
    )(x, prepared["w_qkv"], prepared["b_qkv"], prepared["w_o"], prepared["b_o"])


# ---------------- pure-JAX reference (matches the PyTorch module) ----------------

def msa_reference(x, params, n_heads):
    B, N, D = x.shape
    dh = D // n_heads
    qkv = x @ params["w_qkv"] + params["b_qkv"]                 # (B, N, 3D)
    qkv = qkv.reshape(B, N, 3, n_heads, dh).transpose(2, 0, 3, 1, 4)
    q, k, v = qkv[0], qkv[1], qkv[2]                            # (B, H, N, dh)
    s = jnp.einsum('bhnd,bhmd->bhnm', q, k) / (dh ** 0.5)
    p = jax.nn.softmax(s, axis=-1)
    o = jnp.einsum('bhnm,bhmd->bhnd', p, v)
    o = o.transpose(0, 2, 1, 3).reshape(B, N, D)
    return o @ params["w_o"] + params["b_o"]


def init_msa_params(key, d):
    kq, kqb, ko, kob = jax.random.split(key, 4)
    bound = 1.0 / (d ** 0.5)
    u = lambda k, shape: jax.random.uniform(k, shape, jnp.float32, -bound, bound)
    return {
        "w_qkv": u(kq, (d, 3 * d)),     # == torch qkv.weight.T
        "b_qkv": u(kqb, (3 * d,)),
        "w_o": u(ko, (d, d)),           # == torch out_proj.weight.T
        "b_o": u(kob, (d,)),
    }


if __name__ == "__main__":
    # MyMSA(d=32, n_heads=2) on (B, N, D) token tensors.
    B, N, D, H = 2, 16, 32, 2

    key = jax.random.PRNGKey(0)
    kx, kp = jax.random.split(key)
    x = jax.random.normal(kx, (B, N, D), jnp.float32)
    params = init_msa_params(kp, D)

    # Weight prep happens once, outside the forward-call hot path.
    prepared = prepare_msa_params(params, H)
    prepared = jax.block_until_ready(prepared)

    out = msa_forward(x, prepared, H)
    jax.block_until_ready(out)
    assert out.shape == (B, N, D)

    ref = msa_reference(x, params, H)
    assert jnp.allclose(out, ref, atol=5e-2, rtol=5e-2), (
        f"max abs err {jnp.max(jnp.abs(out - ref))}")
    print("KERNEL_OK")
</pallas_src>

<mosaic_0001>
module attributes {stable_mosaic.version = 11 : i64} {
  func.func @msa_kernel(%arg0: memref<2x16x32xf32, #tpu.memory_space<vmem>>, %arg1: memref<32x96xbf16, #tpu.memory_space<vmem>>, %arg2: memref<1x96xf32, #tpu.memory_space<vmem>>, %arg3: memref<32x32xbf16, #tpu.memory_space<vmem>>, %arg4: memref<1x32xf32, #tpu.memory_space<vmem>>, %arg5: memref<2x16x32xf32, #tpu.memory_space<vmem>>) attributes {dimension_semantics = [], scalar_prefetch = 0 : i64, scratch_operands = 0 : i64, tpu.core_type = #tpu.core_type<tc>} {
    %c0 = arith.constant 0 : index
    %c0_0 = arith.constant 0 : index
    %c0_1 = arith.constant 0 : index
    %0 = vector.load %arg0[%c0, %c0_0, %c0_1] : memref<2x16x32xf32, #tpu.memory_space<vmem>>, vector<2x16x32xf32>
    %1 = vector.shape_cast %0 : vector<2x16x32xf32> to vector<32x32xf32>
    %2 = arith.truncf %1 : vector<32x32xf32> to vector<32x32xbf16>
    %c0_2 = arith.constant 0 : index
    %c0_3 = arith.constant 0 : index
    %3 = vector.load %arg1[%c0_2, %c0_3] : memref<32x96xbf16, #tpu.memory_space<vmem>>, vector<32x96xbf16>
    %cst = arith.constant dense<0.000000e+00> : vector<32x96xf32>
    %4 = tpu.matmul %2, %3, %cst {dimension_numbers = #tpu.dot_dimension_numbers<[1], [0], [0], [1], [0, 0, 1, 1], [], []>} : vector<32x32xbf16>, vector<32x96xbf16>, vector<32x96xf32> -> vector<32x96xf32>
    %c0_4 = arith.constant 0 : index
    %c0_5 = arith.constant 0 : index
    %5 = vector.load %arg2[%c0_4, %c0_5] : memref<1x96xf32, #tpu.memory_space<vmem>>, vector<1x96xf32>
    %6 = vector.broadcast %5 : vector<1x96xf32> to vector<32x96xf32>
    %7 = arith.addf %4, %6 : vector<32x96xf32>
    %8 = vector.extract_strided_slice %7 {offsets = [0, 0], sizes = [32, 16], strides = [1, 1]} : vector<32x96xf32> to vector<32x16xf32>
    %9 = vector.extract_strided_slice %7 {offsets = [0, 32], sizes = [32, 16], strides = [1, 1]} : vector<32x96xf32> to vector<32x16xf32>
    %10 = vector.extract_strided_slice %7 {offsets = [0, 64], sizes = [32, 16], strides = [1, 1]} : vector<32x96xf32> to vector<32x16xf32>
    %11 = vector.shape_cast %8 : vector<32x16xf32> to vector<2x16x16xf32>
    %12 = arith.truncf %11 : vector<2x16x16xf32> to vector<2x16x16xbf16>
    %13 = vector.shape_cast %9 : vector<32x16xf32> to vector<2x16x16xf32>
    %14 = arith.truncf %13 : vector<2x16x16xf32> to vector<2x16x16xbf16>
    %15 = vector.shape_cast %10 : vector<32x16xf32> to vector<2x16x16xf32>
    %16 = arith.truncf %15 : vector<2x16x16xf32> to vector<2x16x16xbf16>
    "tpu.trace_start"() <{level = 10 : i32, message = "bnd,bmd->bnm"}> : () -> ()
    %cst_6 = arith.constant dense<0.000000e+00> : vector<2x16x16xf32>
    %17 = tpu.matmul %12, %14, %cst_6 {dimension_numbers = #tpu.dot_dimension_numbers<[2], [2], [1], [1], [0, 0, 0, 1, 1, 1], [0], [0]>} : vector<2x16x16xbf16>, vector<2x16x16xbf16>, vector<2x16x16xf32> -> vector<2x16x16xf32>
    "tpu.trace_stop"() : () -> ()
    %cst_7 = arith.constant dense<0xFF800000> : vector<2x16xf32>
    %18 = vector.multi_reduction <maximumf>, %17, %cst_7 [2] : vector<2x16x16xf32> to vector<2x16xf32>
    %19 = vector.shape_cast %18 : vector<2x16xf32> to vector<2x16x1xf32>
    %20 = vector.broadcast %19 : vector<2x16x1xf32> to vector<2x16x16xf32>
    %21 = arith.subf %17, %20 : vector<2x16x16xf32>
    %22 = math.exp %21 : vector<2x16x16xf32>
    %cst_8 = arith.constant dense<0.000000e+00> : vector<2x16xf32>
    %23 = vector.multi_reduction <add>, %22, %cst_8 [2] : vector<2x16x16xf32> to vector<2x16xf32>
    %24 = vector.shape_cast %23 : vector<2x16xf32> to vector<2x16x1xf32>
    %25 = tpu.reciprocal %24 {approx = true} : vector<2x16x1xf32> -> vector<2x16x1xf32>
    %26 = vector.broadcast %25 : vector<2x16x1xf32> to vector<2x16x16xf32>
    %27 = arith.mulf %22, %26 : vector<2x16x16xf32>
    %28 = arith.truncf %27 : vector<2x16x16xf32> to vector<2x16x16xbf16>
    "tpu.trace_start"() <{level = 10 : i32, message = "bnm,bmd->bnd"}> : () -> ()
    %cst_9 = arith.constant dense<0.000000e+00> : vector<2x16x16xf32>
    %29 = tpu.matmul %28, %16, %cst_9 {dimension_numbers = #tpu.dot_dimension_numbers<[2], [1], [1], [2], [0, 0, 0, 1, 1, 2], [0], [0]>} : vector<2x16x16xbf16>, vector<2x16x16xbf16>, vector<2x16x16xf32> -> vector<2x16x16xf32>
    "tpu.trace_stop"() : () -> ()
    %30 = vector.shape_cast %29 : vector<2x16x16xf32> to vector<32x16xf32>
    %31 = vector.extract_strided_slice %7 {offsets = [0, 16], sizes = [32, 16], strides = [1, 1]} : vector<32x96xf32> to vector<32x16xf32>
    %32 = vector.extract_strided_slice %7 {offsets = [0, 48], sizes = [32, 16], strides = [1, 1]} : vector<32x96xf32> to vector<32x16xf32>
    %33 = vector.extract_strided_slice %7 {offsets = [0, 80], sizes = [32, 16], strides = [1, 1]} : vector<32x96xf32> to vector<32x16xf32>
    %34 = vector.shape_cast %31 : vector<32x16xf32> to vector<2x16x16xf32>
    %35 = arith.truncf %34 : vector<2x16x16xf32> to vector<2x16x16xbf16>
    %36 = vector.shape_cast %32 : vector<32x16xf32> to vector<2x16x16xf32>
    %37 = arith.truncf %36 : vector<2x16x16xf32> to vector<2x16x16xbf16>
    %38 = vector.shape_cast %33 : vector<32x16xf32> to vector<2x16x16xf32>
    %39 = arith.truncf %38 : vector<2x16x16xf32> to vector<2x16x16xbf16>
    "tpu.trace_start"() <{level = 10 : i32, message = "bnd,bmd->bnm"}> : () -> ()
    %cst_10 = arith.constant dense<0.000000e+00> : vector<2x16x16xf32>
    %40 = tpu.matmul %35, %37, %cst_10 {dimension_numbers = #tpu.dot_dimension_numbers<[2], [2], [1], [1], [0, 0, 0, 1, 1, 1], [0], [0]>} : vector<2x16x16xbf16>, vector<2x16x16xbf16>, vector<2x16x16xf32> -> vector<2x16x16xf32>
    "tpu.trace_stop"() : () -> ()
    %cst_11 = arith.constant dense<0xFF800000> : vector<2x16xf32>
    %41 = vector.multi_reduction <maximumf>, %40, %cst_11 [2] : vector<2x16x16xf32> to vector<2x16xf32>
    %42 = vector.shape_cast %41 : vector<2x16xf32> to vector<2x16x1xf32>
    %43 = vector.broadcast %42 : vector<2x16x1xf32> to vector<2x16x16xf32>
    %44 = arith.subf %40, %43 : vector<2x16x16xf32>
    %45 = math.exp %44 : vector<2x16x16xf32>
    %cst_12 = arith.constant dense<0.000000e+00> : vector<2x16xf32>
    %46 = vector.multi_reduction <add>, %45, %cst_12 [2] : vector<2x16x16xf32> to vector<2x16xf32>
    %47 = vector.shape_cast %46 : vector<2x16xf32> to vector<2x16x1xf32>
    %48 = tpu.reciprocal %47 {approx = true} : vector<2x16x1xf32> -> vector<2x16x1xf32>
    %49 = vector.broadcast %48 : vector<2x16x1xf32> to vector<2x16x16xf32>
    %50 = arith.mulf %45, %49 : vector<2x16x16xf32>
    %51 = arith.truncf %50 : vector<2x16x16xf32> to vector<2x16x16xbf16>
    "tpu.trace_start"() <{level = 10 : i32, message = "bnm,bmd->bnd"}> : () -> ()
    %cst_13 = arith.constant dense<0.000000e+00> : vector<2x16x16xf32>
    %52 = tpu.matmul %51, %39, %cst_13 {dimension_numbers = #tpu.dot_dimension_numbers<[2], [1], [1], [2], [0, 0, 0, 1, 1, 2], [0], [0]>} : vector<2x16x16xbf16>, vector<2x16x16xbf16>, vector<2x16x16xf32> -> vector<2x16x16xf32>
    "tpu.trace_stop"() : () -> ()
    %53 = vector.shape_cast %52 : vector<2x16x16xf32> to vector<32x16xf32>
    %54 = tpu.concatenate %30, %53 in 1 : vector<32x16xf32>, vector<32x16xf32> -> vector<32x32xf32>
    %55 = arith.truncf %54 : vector<32x32xf32> to vector<32x32xbf16>
    %c0_14 = arith.constant 0 : index
    %c0_15 = arith.constant 0 : index
    %56 = vector.load %arg3[%c0_14, %c0_15] : memref<32x32xbf16, #tpu.memory_space<vmem>>, vector<32x32xbf16>
    %cst_16 = arith.constant dense<0.000000e+00> : vector<32x32xf32>
    %57 = tpu.matmul %55, %56, %cst_16 {dimension_numbers = #tpu.dot_dimension_numbers<[1], [0], [0], [1], [0, 0, 1, 1], [], []>} : vector<32x32xbf16>, vector<32x32xbf16>, vector<32x32xf32> -> vector<32x32xf32>
    %c0_17 = arith.constant 0 : index
    %c0_18 = arith.constant 0 : index
    %58 = vector.load %arg4[%c0_17, %c0_18] : memref<1x32xf32, #tpu.memory_space<vmem>>, vector<1x32xf32>
    %59 = vector.broadcast %58 : vector<1x32xf32> to vector<32x32xf32>
    %60 = arith.addf %57, %59 : vector<32x32xf32>
    %61 = vector.shape_cast %60 : vector<32x32xf32> to vector<2x16x32xf32>
    %c0_19 = arith.constant 0 : index
    %c0_20 = arith.constant 0 : index
    %c0_21 = arith.constant 0 : index
    %62 = vector.load %arg5[%c0_19, %c0_20, %c0_21] : memref<2x16x32xf32, #tpu.memory_space<vmem>>, vector<2x16x32xf32>
    tpu.vector_store %arg5[%c0_19, %c0_20, %c0_21], %61 {strides = array<i32>} : memref<2x16x32xf32, #tpu.memory_space<vmem>>, vector<2x16x32xf32>,
    return
  }
}

</mosaic_0001>

<bundles_post_ra>
// kernel: msa_forward.1
= control target key start
LH: loop header
LB: loop body
LE: loop exit
PB: predicated region body
PF: predicated region fallthrough
CT: control target
= control target key end

     0   :  { %10 = vsyncpa [#allocation3], 0  ;;  %s882_s0 = inlined_call_operand.hbm [shape: f32[2,16,32], index: 0, kind: input, shape index: {}]   ;;  %s883_s1 = inlined_call_operand.hbm [shape: bf16[32,96], index: 1, kind: input, shape index: {}]   ;;  %s884_s2 = inlined_call_operand.vmem [shape: f32[1,96], index: 2, kind: input, shape index: {}]   ;;  %s885_s3 = inlined_call_operand.hbm [shape: bf16[32,32], index: 3, kind: input, shape index: {}]   ;;  %s886_s4 = inlined_call_operand.hbm [shape: f32[1,32], index: 4, kind: input, shape index: {}]   ;;  %s887_s5 = inlined_call_operand.hbm [shape: f32[2,16,32], index: 5, kind: output, shape index: {}]  }
   0x1   :  { %11 = vsyncpa [#allocation6], 0 }
   0x2   :  { %12 = vsyncpa [#allocation9], 0  ;;  %s31_s20 = sshll.u32 %s883_s1, 4  ;;  %s32_s20 = int_to_ptr.hbm [resolvable:$true] %s31_s20 }
   0x3   :  { %13 = vsyncpa [#allocation4], 0  ;;  %s748_s21 = smov [#allocation5]   ;;  %s18_s25 = sshll.u32 %s882_s0, 4  ;;  %s19_s25 = int_to_ptr.hbm [resolvable:$true] %s18_s25 }
   0x4   :  { %s33_s22 = sshll.u32 %s748_s21, 4  ;;  %s749_s26 = smov 64   ;;  %s34_s22 = int_to_ptr.vmem [resolvable:$true] %s33_s22 }
   0x5   :  { %s750_s27 = smov 4   ;;  %s751_s28 = smov [#allocation2]  }
   0x6   :  { %39 = dma.hbm_to_vmem [thread:$0]  %s32_s20, 256, %s34_s22, [#allocation6], %s749_s26, %s749_s26, %s750_s27  }
   0x7   :  { %s20_s29 = sshll.u32 %s751_s28, 4  ;;  %s752_s30 = smov 128   ;;  %s21_s29 = int_to_ptr.vmem [resolvable:$true] %s20_s29 }
   0x8   :  { %s753_s1 = smov 8   ;;  %s46_s8 = sshll.u32 %s885_s3, 4  ;;  %s47_s8 = int_to_ptr.hbm [resolvable:$true] %s46_s8 }
   0x9   :  { %26 = dma.hbm_to_vmem [thread:$0]  %s19_s25, 512, %s21_s29, [#allocation3], %s752_s30, %s752_s30, %s753_s1  }
   0xa   :  { %s754_s0 = smov [#allocation7]   ;;  %s60_s12 = sshll.u32 %s886_s4, 4  ;;  %s61_s12 = int_to_ptr.hbm [resolvable:$true] %s60_s12 }
   0xb   :  { %s48_s9 = sshll.u32 %s754_s0, 4  ;;  %s755_s13 = smov [#allocation8]   ;;  %s49_s9 = int_to_ptr.vmem [resolvable:$true] %s48_s9 }
   0xc   :  { %54 = dma.hbm_to_vmem [thread:$0]  %s47_s8, 256, %s49_s9, [#allocation6], %s749_s26, %s749_s26, %s750_s27  }
   0xd   :  { %s62_s14 = sshll.u32 %s755_s13, 4  ;;  %s63_s14 = int_to_ptr.vmem [resolvable:$true] %s62_s14 }
   0xe   :  { %65 = dma.hbm_to_vmem [thread:$0]  %s61_s12, 16, %s63_s14, [#allocation9]  }
   0xf   :  { %740 = dma.done.wait [#allocation3], 512  }
  0x10   :  { %741 = vsyncadd [#allocation3], 4294966784 }
  0x11   :  { %742 = dma.done.wait [#allocation6], 512  }
  0x12   :  { %743 = vsyncadd [#allocation6], 4294966784 }
  0x13   :  { %744 = dma.done.wait [#allocation9], 16  }
  0x14   :  { %745 = vsyncadd [#allocation9], 4294967280  ;;  %v559_v0 = vld [vmem:[#allocation5 + $0x8] sm:$0xff]  ;;  %v558_v1 = vld [vmem:[#allocation5] sm:$0xff]  ;;  %vm109_vm0 = vcmask 261120   ;;  %s756_s15 = smov 80  }
  0x15   :  { %v83_v2 = vld [vmem:[#allocation2] sm:$0xff]  ;;  %122 = vmatpush.bf16.msra.mxu0 %v559_v0  ;;  %v84_v3 = vld [vmem:[#allocation2 + $0x8] sm:$0xff]  ;;  %v85_v5 = vld [vmem:[#allocation2 + $0x10] sm:$0xff]  ;;  %s757_s16 = smov 96   ;;  %vm146_vm1 = vcmask 130048   ;;  %s759_s17 = smov 48  }
  0x16   :  { %v87_v4 = vpack.c.bf16 %v84_v3, %v83_v2  ;;  %v86_v6 = vld [vmem:[#allocation2 + $0x18] sm:$0xff]  ;;  %v586_v9 = vld [vmem:[%s884_s2] ss:$0 sm:$0xff]  ;;  %s758_s2 = smov 112   ;;  %s760_s18 = smov 16  }
  0x17   :  { %v88_v7 = vpack.c.bf16 %v86_v6, %v85_v5  ;;  %s761_s19 = smov [#allocation10]   ;;  %s515_s23 = sshll.u32 %s887_s5, 4  ;;  %s516_s23 = int_to_ptr.hbm [resolvable:$true] %s515_s23 }
  0x18   :  { %s513_s20 = sshll.u32 %s761_s19, 4  ;;  %s514_s20 = int_to_ptr.vmem [resolvable:$true] %s513_s20 }
  0x19   :  { %123 = vmatpush.bf16.msra.mxu0 %v558_v1 }
  0x1c   :  { %538 = vmatmul.msk.bf16.vlgmr.msra.gmra.mxu0 %vm109_vm0, %v87_v4 }
  0x2c   :  { %539 = vmatmul.msk.bf16.gmra.mxu0 %vm109_vm0, %v88_v7 }
  0x99   :  { %v125_v8 = vpop.f32.mrf.mxu0 }
  0x9a   :  { %v126_v10 = vadd.f32 %v586_v9, %v125_v8 }
  0x9c   :  { %v135_v12 = vpack.c.bf16 %v126_v10, %v126_v10 }
  0x9e   :  { %v141_v15 = vunpack.c.l.b16 %v135_v12 }
  0xa1   :  { %v127_v11 = vpop.f32.mrf.mxu0 }
  0xa2   :  { %v128_v13 = vadd.f32 %v586_v9, %v127_v11 }
  0xa4   :  { %v136_v14 = vpack.c.bf16 %v128_v13, %v128_v13 }
  0xa6   :  { %v142_v16 = vunpack.c.l.b16 %v136_v14 }
  0xa8   :  { %v816_v17 = vpack.c.b16 %v142_v16, %v141_v15 }
  0xa9   :  { %v130_v18 = vpop.f32.mrf.mxu0 }
  0xaa   :  { %294 = vrot.lane.b32.xlu1 %v816_v17, %s756_s15  ;;  %144 = vrot.lane.b32.xlu0 %v816_v17, %s757_s16  ;;  %v131_v19 = vadd.f32 %v586_v9, %v130_v18 }
  0xac   :  { %v137_v21 = vpack.c.bf16 %v131_v19, %v131_v19 }
  0xae   :  { %v169_v24 = vunpack.c.l.b16 %v137_v21 }
  0xb1   :  { %v132_v20 = vpop.f32.mrf.mxu0 }
  0xb2   :  { %v133_v22 = vadd.f32 %v586_v9, %v132_v20  ;;  %292 = vrot.lane.b32.xlu1 %v816_v17, %s758_s2 }
  0xb4   :  { %v138_v23 = vpack.c.bf16 %v133_v22, %v133_v22 }
  0xb6   :  { %v170_v25 = vunpack.c.l.b16 %v138_v23 }
  0xb8   :  { %v821_v26 = vpack.c.b16 %v170_v25, %v169_v24 }
  0xba   :  { %318 = vrot.lane.b32.xlu2 %v821_v26, %s756_s15  ;;  %172 = vrot.lane.b32.xlu0 %v821_v26, %s757_s16 }
  0xc2   :  { %316 = vrot.lane.b32.xlu2 %v821_v26, %s758_s2 }
 0x114   :  { %v319_v32 = vpop.permute.xlu2 %318 }
 0x115   :  { %v324_v35 = vsel %vm146_vm1, %v319_v32, 0 }
 0x11c   :  { %v295_v27 = vpop.permute.xlu1 %294  ;;  %v145_v28 = vpop.permute.xlu0 %144 }
 0x11d   :  { %v300_v29 = vsel %vm146_vm1, %v295_v27, 0  ;;  %v151_v30 = vsel %vm146_vm1, %v145_v28, 0  ;;  %v317_v36 = vpop.permute.xlu2 %316 }
 0x11e   :  { %309 = vmatpush.bf16.xpose.msra.mxu1 %v300_v29  ;;  %160 = vmatpush.bf16.xpose.msra.mxu2 %v151_v30 }
 0x124   :  { %v293_v31 = vpop.permute.xlu1 %292 }
 0x125   :  { %544 = vmatmul.msk.bf16.vlgmr.msra.gmra.mxu1 %vm146_vm1, %v293_v31  ;;  %540 = vmatmul.msk.bf16.vlgmr.msra.gmra.mxu2 %vm146_vm1, %v816_v17 }
 0x12c   :  { %v173_v33 = vpop.permute.xlu0 %172 }
 0x12d   :  { %v178_v34 = vsel %vm146_vm1, %v173_v33, 0 }
 0x12e   :  { %187 = vmatpush.bf16.xpose.msrb.mxu2 %v178_v34 }
 0x135   :  { %541 = vmatmul.msk.bf16.vlgmr.msrb.gmra.mxu2 %vm146_vm1, %v821_v26 }
 0x136   :  { %333 = vmatpush.bf16.xpose.msra.mxu2 %v324_v35 }
 0x145   :  { %545 = vmatmul.msk.bf16.vlgmr.msra.gmra.mxu2 %vm146_vm1, %v317_v36 }
 0x1a2   :  { %v311_v39 = vpop.f32.mrf.mxu1 }
 0x1a3   :  { %v340_v41 = vsel %vm146_vm1, %v311_v39, -inf }
 0x1a8   :  { %v162_v37 = vpop.f32.mrf.mxu2 }
 0x1a9   :  { %v194_v38 = vsel %vm146_vm1, %v162_v37, -inf }
 0x1aa   :  { %195 = vmax.xlane.f32.xlu0 %v194_v38  ;;  %v313_v43 = vpop.f32.mrf.mxu1 }
 0x1ab   :  { %v343_v45 = vsel %vm146_vm1, %v313_v43, -inf }
 0x1b0   :  { %v164_v40 = vpop.f32.mrf.mxu2 }
 0x1b1   :  { %v197_v42 = vsel %vm146_vm1, %v164_v40, -inf }
 0x1b2   :  { %341 = vmax.xlane.f32.xlu0 %v340_v41  ;;  %198 = vmax.xlane.f32.xlu1 %v197_v42 }
 0x1b8   :  { %v189_v44 = vpop.f32.mrf.mxu2 }
 0x1b9   :  { %v200_v46 = vsel %vm146_vm1, %v189_v44, -inf }
 0x1ba   :  { %344 = vmax.xlane.f32.xlu1 %v343_v45  ;;  %201 = vmax.xlane.f32.xlu2 %v200_v46 }
 0x1c0   :  { %v191_v47 = vpop.f32.mrf.mxu2 }
 0x1c1   :  { %v203_v48 = vsel %vm146_vm1, %v191_v47, -inf }
 0x1c2   :  { %204 = vmax.xlane.f32.xlu2 %v203_v48 }
 0x1c8   :  { %v335_v49 = vpop.f32.mrf.mxu2 }
 0x1c9   :  { %v346_v50 = vsel %vm146_vm1, %v335_v49, -inf }
 0x1ca   :  { %347 = vmax.xlane.f32.xlu1 %v346_v50 }
 0x1d0   :  { %v337_v51 = vpop.f32.mrf.mxu2 }
 0x1d1   :  { %v349_v52 = vsel %vm146_vm1, %v337_v51, -inf }
 0x1d2   :  { %350 = vmax.xlane.f32.xlu2 %v349_v52 }
 0x21d   :  { %v196_v53 = vpop.xlane.xlu0 %195 }
 0x21e   :  { %v206_v54 = vsub.f32 %v162_v37, %v196_v53 }
 0x220   :  { %v210_v55 = vmul.f32 1.442695, %v206_v54 }
 0x222   :  { %588 = vpow2.f32 %v210_v55 }
 0x225   :  { %v199_v56 = vpop.xlane.xlu1 %198  ;;  %v342_v57 = vpop.xlane.xlu0 %341 }
 0x226   :  { %v207_v58 = vsub.f32 %v164_v40, %v199_v56  ;;  %v352_v59 = vsub.f32 %v311_v39, %v342_v57 }
 0x228   :  { %v589_v60 = vpop.eup %588  ;;  %v212_v61 = vmul.f32 1.442695, %v207_v58  ;;  %v356_v62 = vmul.f32 1.442695, %v352_v59 }
 0x229   :  { %v218_v63 = vsel %vm146_vm1, %v589_v60, 0.0 }
 0x22a   :  { %590 = vpow2.f32 %v212_v61  ;;  %219 = vadd.xlane.f32.xlu2 %v218_v63 }
 0x22b   :  { %592 = vpow2.f32 %v356_v62 }
 0x22d   :  { %v202_v0 = vpop.xlane.xlu2 %201  ;;  %v345_v14 = vpop.xlane.xlu1 %344 }
 0x22e   :  { %v208_v1 = vsub.f32 %v189_v44, %v202_v0  ;;  %v353_v15 = vsub.f32 %v313_v43, %v345_v14 }
 0x230   :  { %v591_v2 = vpop.eup %590  ;;  %v214_v3 = vmul.f32 1.442695, %v208_v1  ;;  %v358_v16 = vmul.f32 1.442695, %v353_v15 }
 0x231   :  { %v845_v4 = vpop.eup %592  ;;  %v221_v5 = vsel %vm146_vm1, %v591_v2, 0.0 }
 0x232   :  { %222 = vadd.xlane.f32.xlu0 %v221_v5  ;;  %v364_v6 = vsel %vm146_vm1, %v845_v4, 0.0  ;;  %594 = vpow2.f32 %v214_v3 }
 0x233   :  { %365 = vadd.xlane.f32.xlu2 %v364_v6 }
 0x235   :  { %v205_v7 = vpop.xlane.xlu2 %204 }
 0x236   :  { %v209_v8 = vsub.f32 %v191_v47, %v205_v7 }
 0x238   :  { %v216_v9 = vmul.f32 1.442695, %v209_v8  ;;  %v595_v10 = vpop.eup %594 }
 0x239   :  { %v224_v11 = vsel %vm146_vm1, %v595_v10, 0.0 }
 0x23a   :  { %596 = vpow2.f32 %v216_v9  ;;  %225 = vadd.xlane.f32.xlu1 %v224_v11 }
 0x23b   :  { %598 = vpow2.f32 %v358_v16 }
 0x23d   :  { %v348_v18 = vpop.xlane.xlu1 %347 }
 0x23e   :  { %v354_v20 = vsub.f32 %v335_v49, %v348_v18  ;;  %v561_v18 = vld [vmem:[#allocation7 + $0x8] sm:$0xff] }
 0x23f   :  { %492 = vmatpush.bf16.msrb.mxu1 %v561_v18 }
 0x240   :  { %v597_v12 = vpop.eup %596  ;;  %v360_v23 = vmul.f32 1.442695, %v354_v20 }
 0x241   :  { %v227_v13 = vsel %vm146_vm1, %v597_v12, 0.0  ;;  %v599_v19 = vpop.eup %598 }
 0x242   :  { %228 = vadd.xlane.f32.xlu2 %v227_v13  ;;  %v367_v22 = vsel %vm146_vm1, %v599_v19, 0.0  ;;  %600 = vpow2.f32 %v360_v23 }
 0x245   :  { %v351_v21 = vpop.xlane.xlu2 %350 }
 0x246   :  { %247 = vrot.lane.b32.xlu0 %v816_v17, %s749_s26  ;;  %v355_v24 = vsub.f32 %v337_v51, %v351_v21 }
 0x248   :  { %v362_v25 = vmul.f32 1.442695, %v355_v24  ;;  %v601_v27 = vpop.eup %600 }
 0x249   :  { %v370_v28 = vsel %vm146_vm1, %v601_v27, 0.0 }
 0x24a   :  { %602 = vpow2.f32 %v362_v25  ;;  %v560_v25 = vld [vmem:[#allocation7] sm:$0xff] }
 0x24b   :  { %493 = vmatpush.bf16.msrb.mxu1 %v560_v25 }
 0x253   :  { %272 = vrot.lane.b32.xlu1 %v821_v26, %s749_s26 }
 0x25a   :  { %393 = vrot.lane.b32.xlu2 %v816_v17, %s759_s17  ;;  %v603_v17 = vpop.eup %602 }
 0x25b   :  { %v373_v29 = vsel %vm146_vm1, %v603_v17, 0.0 }
 0x270   :  { %368 = vadd.xlane.f32.xlu0 %v367_v22 }
 0x27d   :  { %371 = vadd.xlane.f32.xlu1 %v370_v28 }
 0x283   :  { %374 = vadd.xlane.f32.xlu2 %v373_v29 }
 0x284   :  { %418 = vrot.lane.b32.xlu0 %v821_v26, %s759_s17 }
 0x29d   :  { %v220_v30 = vpop.xlane.xlu2 %219 }
 0x2a5   :  { %v223_v31 = vpop.xlane.xlu0 %222 }
 0x2a6   :  { %604 = vrcp.f32 %v223_v31  ;;  %v366_v34 = vpop.xlane.xlu2 %365 }
 0x2a7   :  { %606 = vrcp.f32 %v220_v30 }
 0x2ac   :  { %v605_v32 = vpop.eup %604 }
 0x2ad   :  { %v607_v33 = vpop.eup %606  ;;  %v235_v35 = vmul.f32 %v605_v32, %v591_v2  ;;  %v226_v38 = vpop.xlane.xlu1 %225 }
 0x2ae   :  { %v234_v36 = vmul.f32 %v607_v33, %v589_v60 }
 0x2af   :  { %v239_v37 = vpack.c.bf16 %v235_v35, %v235_v35 }
 0x2b0   :  { %v238_v39 = vpack.c.bf16 %v234_v36, %v234_v36 }
 0x2b1   :  { %v245_v41 = vunpack.c.l.b16 %v239_v37 }
 0x2b2   :  { %v244_v43 = vunpack.c.l.b16 %v238_v39 }
 0x2b4   :  { %v246_v26 = vpack.c.b16 %v245_v41, %v244_v43 }
 0x2b5   :  { %v229_v40 = vpop.xlane.xlu2 %228 }
 0x2b6   :  { %608 = vrcp.f32 %v229_v40 }
 0x2b7   :  { %610 = vrcp.f32 %v226_v38  ;;  %v587_v38 = vld [vmem:[#allocation8] ss:$0 sm:$0xff] }
 0x2b8   :  { %v248_v42 = vpop.permute.xlu0 %247  ;;  %612 = vrcp.f32 %v366_v34 }
 0x2b9   :  { %260 = vmatpush.bf16.msra.mxu3 %v248_v42 }
 0x2bc   :  { %v609_v44 = vpop.eup %608  ;;  %542 = vmatmul.msk.bf16.vlgmr.msra.gmra.mxu3 %vm146_vm1, %v246_v26 }
 0x2bd   :  { %v611_v45 = vpop.eup %610  ;;  %v237_v46 = vmul.f32 %v609_v44, %v597_v12  ;;  %v394_v52 = vpop.permute.xlu2 %393 }
 0x2be   :  { %v236_v47 = vmul.f32 %v611_v45, %v595_v10  ;;  %v613_v56 = vpop.eup %612 }
 0x2bf   :  { %v241_v48 = vpack.c.bf16 %v237_v46, %v237_v46  ;;  %v380_v57 = vmul.f32 %v613_v56, %v845_v4 }
 0x2c0   :  { %v240_v49 = vpack.c.bf16 %v236_v47, %v236_v47 }
 0x2c1   :  { %v270_v50 = vunpack.c.l.b16 %v241_v48  ;;  %v384_v59 = vpack.c.bf16 %v380_v57, %v380_v57 }
 0x2c2   :  { %v269_v53 = vunpack.c.l.b16 %v240_v49 }
 0x2c3   :  { %v390_v62 = vunpack.c.l.b16 %v384_v59 }
 0x2c4   :  { %v271_v54 = vpack.c.b16 %v270_v50, %v269_v53 }
 0x2c5   :  { %v273_v51 = vpop.permute.xlu1 %272 }
 0x2c6   :  { %285 = vmatpush.bf16.msrb.mxu3 %v273_v51 }
 0x2ca   :  { %406 = vmatpush.bf16.msra.mxu3 %v394_v52 }
 0x2cc   :  { %543 = vmatmul.msk.bf16.vlgmr.msrb.gmra.mxu3 %vm146_vm1, %v271_v54 }
 0x2e3   :  { %v369_v55 = vpop.xlane.xlu0 %368 }
 0x2e4   :  { %614 = vrcp.f32 %v369_v55 }
 0x2ea   :  { %v615_v58 = vpop.eup %614 }
 0x2eb   :  { %v381_v60 = vmul.f32 %v615_v58, %v599_v19 }
 0x2ed   :  { %v385_v61 = vpack.c.bf16 %v381_v60, %v381_v60 }
 0x2ef   :  { %v391_v63 = vunpack.c.l.b16 %v385_v61 }
 0x2f0   :  { %v372_v1 = vpop.xlane.xlu1 %371 }
 0x2f1   :  { %v392_v0 = vpack.c.b16 %v391_v63, %v390_v62  ;;  %616 = vrcp.f32 %v372_v1 }
 0x2f3   :  { %546 = vmatmul.msk.bf16.vlgmr.msra.gmra.mxu3 %vm146_vm1, %v392_v0 }
 0x2f6   :  { %v375_v2 = vpop.xlane.xlu2 %374  ;;  %v419_v3 = vpop.permute.xlu0 %418 }
 0x2f7   :  { %618 = vrcp.f32 %v375_v2  ;;  %431 = vmatpush.bf16.msrb.mxu0 %v419_v3  ;;  %v617_v5 = vpop.eup %616 }
 0x2f8   :  { %v382_v6 = vmul.f32 %v617_v5, %v601_v27 }
 0x2fa   :  { %v386_v8 = vpack.c.bf16 %v382_v6, %v382_v6 }
 0x2fc   :  { %v415_v10 = vunpack.c.l.b16 %v386_v8 }
 0x2fd   :  { %v619_v7 = vpop.eup %618 }
 0x2fe   :  { %v383_v4 = vmul.f32 %v619_v7, %v603_v17 }
 0x300   :  { %v387_v9 = vpack.c.bf16 %v383_v4, %v383_v4 }
 0x302   :  { %v416_v11 = vunpack.c.l.b16 %v387_v9 }
 0x304   :  { %v417_v12 = vpack.c.b16 %v416_v11, %v415_v10 }
 0x306   :  { %547 = vmatmul.msk.bf16.vlgmr.msrb.gmra.mxu0 %vm146_vm1, %v417_v12 }
 0x33f   :  { %v262_v13 = vpop.f32.mrf.mxu3 }
 0x347   :  { %v264_v14 = vpop.f32.mrf.mxu3 }
 0x34f   :  { %v287_v15 = vpop.f32.mrf.mxu3 }
 0x357   :  { %v289_v16 = vpop.f32.mrf.mxu3 }
 0x376   :  { %v408_v19 = vpop.f32.mrf.mxu3 }
 0x37e   :  { %v410_v20 = vpop.f32.mrf.mxu3 }
 0x37f   :  { %v576_v21 = vpack.i.bf16 %v410_v20, %v408_v19 }
 0x381   :  { %577 = vrot.lane.b32.xlu1 %v576_v21, %s760_s18 }
 0x383   :  { %v433_v22 = vpop.f32.mrf.mxu0 }
 0x38b   :  { %v435_v23 = vpop.f32.mrf.mxu0 }
 0x38c   :  { %v581_v24 = vpack.i.bf16 %v435_v23, %v433_v22 }
 0x38e   :  { %582 = vrot.lane.b32.xlu0 %v581_v24, %s760_s18 }
 0x3f3   :  { %v578_v27 = vpop.permute.xlu1 %577 }
 0x3f4   :  { %v580_v28 = vunpack.i.h.bf16 %v578_v27  ;;  %v579_v17 = vunpack.i.l.bf16 %v578_v27 }
 0x3f6   :  { %v455_v29 = vsel %vm146_vm1, %v264_v14, %v580_v28  ;;  %v454_v30 = vsel %vm146_vm1, %v262_v13, %v579_v17 }
 0x3f7   :  { %v458_v31 = vpack.c.bf16 %v455_v29, %v454_v30 }
 0x3f9   :  { %556 = vmatmul.msk.bf16.vlgmr.msrb.gmra.mxu1 %vm109_vm0, %v458_v31 }
 0x400   :  { %v583_v32 = vpop.permute.xlu0 %582 }
 0x401   :  { %v585_v33 = vunpack.i.h.bf16 %v583_v32  ;;  %v584_v34 = vunpack.i.l.bf16 %v583_v32 }
 0x403   :  { %v456_v35 = vsel %vm146_vm1, %v287_v15, %v584_v34  ;;  %v457_v36 = vsel %vm146_vm1, %v289_v16, %v585_v33 }
 0x404   :  { %v459_v37 = vpack.c.bf16 %v457_v36, %v456_v35 }
 0x409   :  { %557 = vmatmul.msk.bf16.gmra.mxu1 %vm109_vm0, %v459_v37 }
 0x476   :  { %v495_v39 = vpop.f32.mrf.mxu1 }
 0x477   :  { %v496_v40 = vadd.f32 %v587_v38, %v495_v39 }
 0x479   :  { %505 = vst.msk [vmem:[#allocation10] sm:$0xff] %vm109_vm0, %v496_v40 }
 0x47e   :  { %v497_v41 = vpop.f32.mrf.mxu1 }
 0x47f   :  { %v498_v42 = vadd.f32 %v587_v38, %v497_v41 }
 0x481   :  { %506 = vst.msk [vmem:[#allocation10 + $0x8] sm:$0xff] %vm109_vm0, %v498_v42 }
 0x486   :  { %v500_v43 = vpop.f32.mrf.mxu1 }
 0x487   :  { %v501_v26 = vadd.f32 %v587_v38, %v500_v43 }
 0x489   :  { %507 = vst.msk [vmem:[#allocation10 + $0x10] sm:$0xff] %vm109_vm0, %v501_v26 }
 0x48e   :  { %v502_v44 = vpop.f32.mrf.mxu1 }
 0x48f   :  { %v503_v45 = vadd.f32 %v587_v38, %v502_v44 }
 0x491   :  { %508 = vst.msk [vmem:[#allocation10 + $0x18] sm:$0xff] %vm109_vm0, %v503_v45 }
 0x492   :  { %521 = dma.vmem_to_hbm [thread:$0]  %s514_s20, 512, %s516_s23, [#allocation4], %s752_s30, %s752_s30, %s753_s1  }
 0x493   :  { %746 = dma.done.wait [#allocation4], 512  }
 0x494   :  { %747 = vsyncadd [#allocation4], 4294966784 }
 0x495   :  { %526 = vsyncpa [#allocation3], 1 }
 0x496   :  { %527 = vsyncpa [#allocation6], 1 }
 0x497   :  { %528 = vsyncpa [#allocation9], 1 }
 0x498   :  { %529 = vsyncpa [#allocation4], 1 }

</bundles_post_ra>
